<compile_context>
chip_gen: v5e
topology: v5e:2x2
jax: 0.10.0
libtpu: 0.0.40
codegen_flags: <defaults>
</compile_context>

<pallas_src>
import functools
import math

import jax
import jax.numpy as jnp
from jax.experimental import pallas as pl
from jax.experimental.pallas import tpu as pltpu


def _layernorm_store(y, gamma_ref, beta_ref, o_ref, eps):
    """LayerNorm over last axis with single-pass stats, then affine + store."""
    d = y.shape[-1]
    inv_d = 1.0 / d
    mean = jnp.sum(y, axis=-1, keepdims=True) * inv_d
    mean_sq = jnp.sum(y * y, axis=-1, keepdims=True) * inv_d
    var = jnp.maximum(mean_sq - mean * mean, 0.0)       # biased var (torch LayerNorm)
    normed = (y - mean) * jax.lax.rsqrt(var + eps)
    o_ref[...] = (normed * gamma_ref[...] + beta_ref[...]).astype(o_ref.dtype)


def _addnorm_eval_kernel(x_ref, sub_ref, gamma_ref, beta_ref, o_ref, *, eps):
    """Eval mode: y = LN(x + sub) * gamma + beta."""
    y = x_ref[...].astype(jnp.float32) + sub_ref[...].astype(jnp.float32)
    _layernorm_store(y, gamma_ref, beta_ref, o_ref, eps)


def _addnorm_train_kernel(x_ref, sub_ref, mask_ref, gamma_ref, beta_ref, o_ref, *, eps):
    """Train mode: y = LN(x + sub * scaled_keep_mask) * gamma + beta."""
    y = (x_ref[...].astype(jnp.float32)
         + sub_ref[...].astype(jnp.float32) * mask_ref[...])
    _layernorm_store(y, gamma_ref, beta_ref, o_ref, eps)


def addnorm(x, sublayer, gamma, beta, *, key=None, p=0.1, eps=1e-5,
            training=True, block_rows=None,
            vmem_budget_bytes=24 * 1024 * 1024):
    """AddNorm forward.  x, sublayer: (..., d_model); gamma/beta: (d_model,)."""
    assert x.shape == sublayer.shape
    assert 0.0 <= p < 1.0, "dropout prob must be in [0, 1)"
    d_model = x.shape[-1]
    lead_shape = x.shape[:-1]
    rows = int(math.prod(lead_shape)) if lead_shape else 1

    x2 = x.reshape(rows, d_model)
    s2 = sublayer.reshape(rows, d_model)
    gamma2 = gamma.astype(jnp.float32).reshape(1, d_model)
    beta2 = beta.astype(jnp.float32).reshape(1, d_model)

    use_dropout = training and p > 0.0
    if use_dropout:
        if key is None:
            key = jax.random.PRNGKey(0)
        # Mask is independent of the tile decomposition -> reproducible across
        # block_rows tunings.  Scaled keep mask folds the 1/(1-p) in.
        keep = jax.random.bernoulli(key, 1.0 - p, (rows, d_model))
        mask2 = keep.astype(jnp.float32) * (1.0 / (1.0 - p))

    # ---- Choose the row tile: biggest that fits the VMEM budget. ----------
    # Streams per grid step: x, sublayer, (mask), out; each double-buffered f32.
    n_streams = 4 if use_dropout else 3
    if block_rows is None:
        max_rows_by_vmem = vmem_budget_bytes // (n_streams * 2 * d_model * 4)
        block_rows = int(min(rows, max(8, max_rows_by_vmem), 2048))
        if block_rows < rows:
            block_rows = max(8, (block_rows // 8) * 8)   # sublane alignment

    # Pad rows so the grid divides evenly (padded rows are sliced off after).
    n_blocks = -(-rows // block_rows)                    # ceil div
    padded_rows = n_blocks * block_rows
    if padded_rows != rows:
        pad = padded_rows - rows
        x2 = jnp.pad(x2, ((0, pad), (0, 0)))
        s2 = jnp.pad(s2, ((0, pad), (0, 0)))
        if use_dropout:
            mask2 = jnp.pad(mask2, ((0, pad), (0, 0)))

    row_spec = pl.BlockSpec((block_rows, d_model), lambda i: (i, 0))
    vec_spec = pl.BlockSpec((1, d_model), lambda i: (0, 0))

    in_specs = [row_spec, row_spec]
    operands = [x2, s2]
    if use_dropout:
        in_specs.append(row_spec)
        operands.append(mask2)
    in_specs += [vec_spec, vec_spec]
    operands += [gamma2, beta2]

    kernel = functools.partial(
        _addnorm_train_kernel if use_dropout else _addnorm_eval_kernel, eps=eps)

    out = pl.pallas_call(
        kernel,
        out_shape=jax.ShapeDtypeStruct((padded_rows, d_model), x.dtype),
        grid=(n_blocks,),
        in_specs=in_specs,
        out_specs=row_spec,
        compiler_params=pltpu.CompilerParams(
            dimension_semantics=("parallel",),               # shards across TCs on v7x
            vmem_limit_bytes=max(2 * vmem_budget_bytes, 32 * 1024 * 1024)),
    )(*operands)

    return out[:rows].reshape(*lead_shape, d_model)


if __name__ == "__main__":
    # Small shapes implied by the module: (batch, seq, d_model)
    batch, seq, d_model = 2, 8, 32

    key = jax.random.PRNGKey(0)
    kx, ks, kd = jax.random.split(key, 3)
    x = jax.random.normal(kx, (batch, seq, d_model), dtype=jnp.float32)
    sublayer = jax.random.normal(ks, (batch, seq, d_model), dtype=jnp.float32)

    # Deterministic LayerNorm parameters (PyTorch init: weight=1, bias=0).
    gamma = jnp.ones((d_model,), dtype=jnp.float32)
    beta = jnp.zeros((d_model,), dtype=jnp.float32)

    def ln_ref(y):
        mean = jnp.mean(y, axis=-1, keepdims=True)
        var = jnp.mean((y - mean) ** 2, axis=-1, keepdims=True)
        return (y - mean) / jnp.sqrt(var + 1e-5) * gamma + beta

    # Eval mode (dropout = identity) -> check against a pure-JAX reference.
    out_eval = jax.block_until_ready(addnorm(x, sublayer, gamma, beta, training=False))
    ref_eval = ln_ref(x + sublayer)
    assert jnp.allclose(out_eval, ref_eval, atol=1e-4, rtol=1e-4), "eval-mode mismatch"

    # Train mode (p=0.1). Mask is reproducible from the key, so we can check exactly.
    p = 0.1
    out_train = jax.block_until_ready(
        addnorm(x, sublayer, gamma, beta, key=kd, p=p, training=True))
    keep = jax.random.bernoulli(kd, 1.0 - p, (batch * seq, d_model))
    mask = (keep.astype(jnp.float32) * (1.0 / (1.0 - p))).reshape(batch, seq, d_model)
    ref_train = ln_ref(x + sublayer * mask)
    assert out_train.shape == (batch, seq, d_model)
    assert jnp.allclose(out_train, ref_train, atol=1e-4, rtol=1e-4), "train-mode mismatch"

    print("KERNEL_OK")
</pallas_src>

<mosaic_0001>
module attributes {stable_mosaic.version = 11 : i64} {
  func.func @_addnorm_eval_kernel(%arg0: i32, %arg1: memref<16x32xf32, #tpu.memory_space<vmem>>, %arg2: memref<16x32xf32, #tpu.memory_space<vmem>>, %arg3: memref<1x32xf32, #tpu.memory_space<vmem>>, %arg4: memref<1x32xf32, #tpu.memory_space<vmem>>, %arg5: memref<16x32xf32, #tpu.memory_space<vmem>>) attributes {dimension_semantics = [#tpu.dimension_semantics<parallel>], iteration_bounds = array<i64: 1>, scalar_prefetch = 0 : i64, scratch_operands = 0 : i64, tpu.core_type = #tpu.core_type<tc>, window_params = [{transform_indices = @transform_0, window_bounds = array<i64: 16, 32>}, {transform_indices = @transform_1, window_bounds = array<i64: 16, 32>}, {pipeline_mode = #tpu.pipeline_mode<synchronous>, transform_indices = @transform_2, window_bounds = array<i64: 1, 32>}, {pipeline_mode = #tpu.pipeline_mode<synchronous>, transform_indices = @transform_3, window_bounds = array<i64: 1, 32>}, {transform_indices = @transform_4, window_bounds = array<i64: 16, 32>}]} {
    %c0 = arith.constant 0 : index
    %c0_0 = arith.constant 0 : index
    %0 = vector.load %arg1[%c0, %c0_0] : memref<16x32xf32, #tpu.memory_space<vmem>>, vector<16x32xf32>
    %c0_1 = arith.constant 0 : index
    %c0_2 = arith.constant 0 : index
    %1 = vector.load %arg2[%c0_1, %c0_2] : memref<16x32xf32, #tpu.memory_space<vmem>>, vector<16x32xf32>
    %2 = arith.addf %0, %1 : vector<16x32xf32>
    %cst = arith.constant dense<0.000000e+00> : vector<16xf32>
    %3 = vector.multi_reduction <add>, %2, %cst [1] : vector<16x32xf32> to vector<16xf32>
    %4 = vector.shape_cast %3 : vector<16xf32> to vector<16x1xf32>
    %cst_3 = arith.constant 3.125000e-02 : f32
    %5 = vector.broadcast %cst_3 : f32 to vector<16x1xf32>
    %6 = arith.mulf %4, %5 : vector<16x1xf32>
    %7 = arith.mulf %2, %2 : vector<16x32xf32>
    %cst_4 = arith.constant dense<0.000000e+00> : vector<16xf32>
    %8 = vector.multi_reduction <add>, %7, %cst_4 [1] : vector<16x32xf32> to vector<16xf32>
    %9 = vector.shape_cast %8 : vector<16xf32> to vector<16x1xf32>
    %cst_5 = arith.constant 3.125000e-02 : f32
    %10 = vector.broadcast %cst_5 : f32 to vector<16x1xf32>
    %11 = arith.mulf %9, %10 : vector<16x1xf32>
    %12 = arith.mulf %6, %6 : vector<16x1xf32>
    %13 = arith.subf %11, %12 : vector<16x1xf32>
    %cst_6 = arith.constant 0.000000e+00 : f32
    %14 = vector.broadcast %cst_6 : f32 to vector<16x1xf32>
    %15 = arith.maximumf %13, %14 : vector<16x1xf32>
    %16 = vector.broadcast %6 : vector<16x1xf32> to vector<16x32xf32>
    %17 = arith.subf %2, %16 : vector<16x32xf32>
    %cst_7 = arith.constant 9.99999974E-6 : f32
    %18 = vector.broadcast %cst_7 : f32 to vector<16x1xf32>
    %19 = arith.addf %15, %18 : vector<16x1xf32>
    %20 = math.rsqrt %19 : vector<16x1xf32>
    %21 = vector.broadcast %20 : vector<16x1xf32> to vector<16x32xf32>
    %22 = arith.mulf %17, %21 : vector<16x32xf32>
    %c0_8 = arith.constant 0 : index
    %c0_9 = arith.constant 0 : index
    %23 = vector.load %arg3[%c0_8, %c0_9] : memref<1x32xf32, #tpu.memory_space<vmem>>, vector<1x32xf32>
    %24 = vector.broadcast %23 : vector<1x32xf32> to vector<16x32xf32>
    %25 = arith.mulf %22, %24 : vector<16x32xf32>
    %c0_10 = arith.constant 0 : index
    %c0_11 = arith.constant 0 : index
    %26 = vector.load %arg4[%c0_10, %c0_11] : memref<1x32xf32, #tpu.memory_space<vmem>>, vector<1x32xf32>
    %27 = vector.broadcast %26 : vector<1x32xf32> to vector<16x32xf32>
    %28 = arith.addf %25, %27 : vector<16x32xf32>
    %c0_12 = arith.constant 0 : index
    %c0_13 = arith.constant 0 : index
    %29 = vector.load %arg5[%c0_12, %c0_13] : memref<16x32xf32, #tpu.memory_space<vmem>>, vector<16x32xf32>
    tpu.vector_store %arg5[%c0_12, %c0_13], %28 {strides = array<i32>} : memref<16x32xf32, #tpu.memory_space<vmem>>, vector<16x32xf32>,
    return
  }
  func.func @transform_0(%arg0: i32) -> (i32, i32) {
    %c0_i32 = arith.constant 0 : i32
    %c0_i32_0 = arith.constant 0 : i32
    return %arg0, %c0_i32 : i32, i32
  }
  func.func @transform_1(%arg0: i32) -> (i32, i32) {
    %c0_i32 = arith.constant 0 : i32
    %c0_i32_0 = arith.constant 0 : i32
    return %arg0, %c0_i32 : i32, i32
  }
  func.func @transform_2(%arg0: i32) -> (i32, i32) {
    %c0_i32 = arith.constant 0 : i32
    %c0_i32_0 = arith.constant 0 : i32
    %c0_i32_1 = arith.constant 0 : i32
    return %c0_i32, %c0_i32_0 : i32, i32
  }
  func.func @transform_3(%arg0: i32) -> (i32, i32) {
    %c0_i32 = arith.constant 0 : i32
    %c0_i32_0 = arith.constant 0 : i32
    %c0_i32_1 = arith.constant 0 : i32
    return %c0_i32, %c0_i32_0 : i32, i32
  }
  func.func @transform_4(%arg0: i32) -> (i32, i32) {
    %c0_i32 = arith.constant 0 : i32
    %c0_i32_0 = arith.constant 0 : i32
    return %arg0, %c0_i32 : i32, i32
  }
}

</mosaic_0001>

<bundles_post_ra>
// kernel: tpu_custom_call.1
= control target key start
LH: loop header
LB: loop body
LE: loop exit
PB: predicated region body
PF: predicated region fallthrough
CT: control target
= control target key end

     0   :  { %9 = vsyncpa [#allocation3], 0  ;;  %s290_s0 = inlined_call_operand.hbm [shape: f32[16,32], index: 0, kind: input, shape index: {}]   ;;  %s291_s1 = inlined_call_operand.hbm [shape: f32[16,32], index: 1, kind: input, shape index: {}]   ;;  %s292_s2 = inlined_call_operand.vmem [shape: f32[1,32], index: 2, kind: input, shape index: {}]   ;;  %s293_s3 = inlined_call_operand.vmem [shape: f32[1,32], index: 3, kind: input, shape index: {}]   ;;  %s294_s4 = inlined_call_operand.hbm [shape: f32[16,32], index: 4, kind: output, shape index: {}]  }
   0x1   :  { %10 = vsyncpa [#allocation6], 0 }
   0x2   :  { %11 = vsyncpa [#allocation4], 0  ;;  %s16_s17 = sshll.u32 %s290_s0, 4  ;;  %s230_s18 = smov [#allocation2]   ;;  %s17_s17 = int_to_ptr.hbm [resolvable:$true] %s16_s17 }
   0x3   :  { %s18_s19 = sshll.u32 %s230_s18, 4  ;;  %s29_s22 = sshll.u32 %s291_s1, 4  ;;  %s19_s19 = int_to_ptr.vmem [resolvable:$true] %s18_s19  ;;  %s30_s22 = int_to_ptr.hbm [resolvable:$true] %s29_s22 }
   0x4   :  { %s231_s23 = smov 128   ;;  %s232_s24 = smov 8  }
   0x5   :  { %24 = dma.hbm_to_vmem [thread:$0]  %s17_s17, 256, %s19_s19, [#allocation3], %s231_s23, %s231_s23, %s232_s24  }
   0x6   :  { %s233_s25 = smov [#allocation5]  }
   0x7   :  { %s31_s26 = sshll.u32 %s233_s25, 4  ;;  %s32_s26 = int_to_ptr.vmem [resolvable:$true] %s31_s26 }
   0x8   :  { %37 = dma.hbm_to_vmem [thread:$0]  %s30_s22, 256, %s32_s26, [#allocation6], %s231_s23, %s231_s23, %s232_s24  }
   0x9   :  { %224 = dma.done.wait [#allocation3], 256  }
   0xa   :  { %225 = vsyncadd [#allocation3], 4294967040 }
   0xb   :  { %226 = dma.done.wait [#allocation6], 256  }
   0xc   :  { %227 = vsyncadd [#allocation6], 4294967040  ;;  %v50_v0 = vld [vmem:[#allocation2] sm:$0xff]  ;;  %v52_v1 = vld [vmem:[#allocation5] sm:$0xff]  ;;  %vm56_vm0 = vcmask 261120   ;;  %s127_s6 = sshll.u32 %s294_s4, 4  ;;  %s128_s6 = int_to_ptr.hbm [resolvable:$true] %s127_s6 }
   0xd   :  { %v51_v2 = vld [vmem:[#allocation2 + $0x8] sm:$0xff]  ;;  %v54_v3 = vadd.f32 %v52_v1, %v50_v0  ;;  %v53_v4 = vld [vmem:[#allocation5 + $0x8] sm:$0xff]  ;;  %v146_v37 = vld [vmem:[%s292_s2] ss:$0 sm:$0xff]  ;;  %s234_s2 = smov [#allocation7]  }
   0xe   :  { %v55_v7 = vadd.f32 %v53_v4, %v51_v2  ;;  %v147_v41 = vld [vmem:[%s293_s3] ss:$0 sm:$0xff]  ;;  %s125_s29 = sshll.u32 %s234_s2, 4  ;;  %s126_s29 = int_to_ptr.vmem [resolvable:$true] %s125_s29 }
   0xf   :  { %v57_v5 = vsel %vm56_vm0, %v54_v3, 0.0  ;;  %v65_v6 = vmul.f32 %v54_v3, %v54_v3 }
  0x10   :  { %58 = vadd.xlane.f32.xlu0 %v57_v5  ;;  %v66_v9 = vmul.f32 %v55_v7, %v55_v7  ;;  %v60_v10 = vsel %vm56_vm0, %v55_v7, 0.0 }
  0x11   :  { %v67_v8 = vsel %vm56_vm0, %v65_v6, 0.0 }
  0x12   :  { %68 = vadd.xlane.f32.xlu1 %v67_v8  ;;  %v70_v11 = vsel %vm56_vm0, %v66_v9, 0.0 }
  0x18   :  { %61 = vadd.xlane.f32.xlu0 %v60_v10 }
  0x1a   :  { %71 = vadd.xlane.f32.xlu1 %v70_v11 }
  0x83   :  { %v59_v12 = vpop.xlane.xlu0 %58 }
  0x84   :  { %v63_v13 = vmul.f32 0.03125, %v59_v12 }
  0x85   :  { %v69_v14 = vpop.xlane.xlu1 %68 }
  0x86   :  { %v75_v15 = vmul.f32 %v63_v13, %v63_v13  ;;  %v73_v16 = vmul.f32 0.03125, %v69_v14  ;;  %v81_v35 = vsub.f32 %v54_v3, %v63_v13 }
  0x88   :  { %v77_v17 = vsub.f32 %v73_v16, %v75_v15 }
  0x8a   :  { %v79_v18 = vmax.f32 %v77_v17, 0.0 }
  0x8b   :  { %v62_v19 = vpop.xlane.xlu0 %61 }
  0x8c   :  { %v83_v20 = vadd.f32 1e-05, %v79_v18  ;;  %v64_v21 = vmul.f32 0.03125, %v62_v19 }
  0x8d   :  { %v72_v22 = vpop.xlane.xlu1 %71 }
  0x8e   :  { %148 = vrsqrt.f32 %v83_v20  ;;  %v76_v23 = vmul.f32 %v64_v21, %v64_v21  ;;  %v74_v24 = vmul.f32 0.03125, %v72_v22  ;;  %vm91_vm2 = vweird.f32 %v83_v20 }
  0x8f   :  { %v82_v47 = vsub.f32 %v55_v7, %v64_v21 }
  0x90   :  { %v78_v25 = vsub.f32 %v74_v24, %v76_v23 }
  0x92   :  { %v80_v26 = vmax.f32 %v78_v25, 0.0 }
  0x94   :  { %v149_v27 = vpop.eup %148  ;;  %v84_v29 = vadd.f32 1e-05, %v80_v26 }
  0x95   :  { %v86_v28 = vmul.f32 %v149_v27, %v83_v20  ;;  %vm92_vm1 = vweird.f32 %v149_v27 }
  0x96   :  { %150 = vrsqrt.f32 %v84_v29  ;;  %vm93_vm3 = vmor %vm91_vm2, %vm92_vm1  ;;  %vm101_vm5 = vweird.f32 %v84_v29 }
  0x97   :  { %v87_v30 = vmul.f32 %v149_v27, %v86_v28 }
  0x99   :  { %v88_v31 = vmul.f32 0.5, %v87_v30 }
  0x9b   :  { %v89_v32 = vsub.f32 1.5, %v88_v31 }
  0x9c   :  { %v151_v33 = vpop.eup %150 }
  0x9d   :  { %v90_v34 = vmul.f32 %v149_v27, %v89_v32  ;;  %v96_v36 = vmul.f32 %v151_v33, %v84_v29  ;;  %vm102_vm4 = vweird.f32 %v151_v33 }
  0x9e   :  { %vm103_vm6 = vmor %vm101_vm5, %vm102_vm4 }
  0x9f   :  { %v94_v38 = vsel %vm93_vm3, %v149_v27, %v90_v34  ;;  %v97_v40 = vmul.f32 %v151_v33, %v96_v36 }
  0xa0   :  { %v105_v39 = vmul.f32 %v94_v38, %v81_v35 }
  0xa1   :  { %v98_v42 = vmul.f32 0.5, %v97_v40 }
  0xa2   :  { %v111_v43 = vmul.f32 %v146_v37, %v105_v39 }
  0xa3   :  { %v99_v44 = vsub.f32 1.5, %v98_v42 }
  0xa4   :  { %v117_v45 = vadd.f32 %v147_v41, %v111_v43 }
  0xa5   :  { %v100_v46 = vmul.f32 %v151_v33, %v99_v44 }
  0xa6   :  { %119 = vst.msk [vmem:[#allocation7] sm:$0xff] %vm56_vm0, %v117_v45 }
  0xa7   :  { %v104_v48 = vsel %vm103_vm6, %v151_v33, %v100_v46 }
  0xa8   :  { %v106_v49 = vmul.f32 %v104_v48, %v82_v47 }
  0xaa   :  { %v112_v50 = vmul.f32 %v146_v37, %v106_v49 }
  0xac   :  { %v118_v51 = vadd.f32 %v147_v41, %v112_v50 }
  0xae   :  { %120 = vst.msk [vmem:[#allocation7 + $0x8] sm:$0xff] %vm56_vm0, %v118_v51 }
  0xaf   :  { %133 = dma.vmem_to_hbm [thread:$0]  %s126_s29, 256, %s128_s6, [#allocation4], %s231_s23, %s231_s23, %s232_s24  }
  0xb0   :  { %228 = dma.done.wait [#allocation4], 256  }
  0xb1   :  { %229 = vsyncadd [#allocation4], 4294967040 }
  0xb2   :  { %138 = vsyncpa [#allocation3], 1 }
  0xb3   :  { %139 = vsyncpa [#allocation6], 1 }
  0xb4   :  { %140 = vsyncpa [#allocation4], 1 }

</bundles_post_ra>
